<compile_context>
chip_gen: v7x
topology: tpu7x:2x2x1
jax: 0.10.0
libtpu: 0.0.40
codegen_flags: <defaults>
</compile_context>

<pallas_src>
import functools

import jax
import jax.numpy as jnp
from jax.experimental import pallas as pl
from jax.experimental.pallas import tpu as pltpu

IGNORE_INDEX = -1
SMOOTH = 1e-6


def _round_up(x, m):
    return (x + m - 1) // m * m


def _dice_sums_kernel(logits_ref, tgt_ref, inter_ref, union_ref,
                      inter_acc, union_acc, *,
                      num_classes, n_valid, tile_n, needs_mask):
    # logits_ref: [1, C, TN]   tgt_ref: [1, 1, TN] i32
    # inter_ref/union_ref: [1, 1, 1, C] f32 outputs (written once per segment)
    # inter_acc/union_acc: [C, TN] f32 VMEM scratch (lane-wise partial sums)
    t = pl.program_id(2)

    @pl.when(t == 0)
    def _():
        inter_acc[...] = jnp.zeros_like(inter_acc)
        union_acc[...] = jnp.zeros_like(union_acc)

    logits = logits_ref[0].astype(jnp.float32)       # [C, TN]
    tgt = tgt_ref[0]                                 # [1, TN] int32

    # softmax over the channel (sublane) axis: exp + single-row reciprocal + mul
    m = jnp.max(logits, axis=0, keepdims=True)       # [1, TN]
    e = jnp.exp(logits - m)                          # [C, TN]
    denom = jnp.sum(e, axis=0, keepdims=True)        # [1, TN]
    probs = e * pl.reciprocal(denom, approx=False)   # [C, TN]

    valid = tgt != IGNORE_INDEX                      # [1, TN] bool
    tgt_c = jnp.where(valid, tgt, 0)                 # ignored pixels -> class 0
    class_ids = jax.lax.broadcasted_iota(jnp.int32, (num_classes, tile_n), 0)
    hit = class_ids == tgt_c                         # [C, TN] bool (one-hot mask)

    if needs_mask:
        # exclude spatial-padding lanes from both probs and the one-hot
        p = pl.program_id(1)
        lane = jax.lax.broadcasted_iota(jnp.int32, (1, tile_n), 1)
        pos = (p * pl.num_programs(2) + t) * tile_n + lane
        in_bounds = pos < n_valid
        valid = jnp.logical_and(valid, in_bounds)
        hit = jnp.logical_and(hit, in_bounds)

    probs = probs * valid.astype(probs.dtype)        # zero ignored / padded pixels

    # lane-wise partial accumulation only (pure VPU adds; no XLU per tile)
    inter_acc[...] += jnp.where(hit, probs, 0.0)
    union_acc[...] += probs + hit.astype(probs.dtype)

    # once-per-(batch, partition) epilogue: cross-lane reduce + layout shuffle
    @pl.when(t == pl.num_programs(2) - 1)
    def _():
        inter_ref[...] = jnp.sum(inter_acc[...], axis=1).reshape(1, 1, 1, num_classes)
        union_ref[...] = jnp.sum(union_acc[...], axis=1).reshape(1, 1, 1, num_classes)


@functools.partial(jax.jit, static_argnames=("tile_n", "num_partitions"))
def weighted_dice_loss(outputs, targets, class_weights, tile_n=8192,
                       num_partitions=2):
    """outputs: [B, C, H, W] float logits; targets: [B, H, W] int labels (-1 ignored)."""
    B, C, H, W = outputs.shape
    N = H * W

    # tile sizing: lane-multiple, capped to the (rounded) spatial extent
    tile_n = min(_round_up(int(tile_n), 128), _round_up(N, 128))
    # don't create partitions that would only ever see padding
    num_partitions = max(1, min(int(num_partitions), pl.cdiv(N, tile_n)))
    n_pad = _round_up(N, tile_n * num_partitions)
    tiles_per_part = n_pad // (tile_n * num_partitions)
    needs_mask = n_pad != N

    logits = outputs.reshape(B, C, N)
    tgt = targets.reshape(B, 1, N).astype(jnp.int32)
    if needs_mask:
        pad = n_pad - N
        logits = jnp.pad(logits, ((0, 0), (0, 0), (0, pad)))
        tgt = jnp.pad(tgt, ((0, 0), (0, 0), (0, pad)),
                      constant_values=IGNORE_INDEX)

    kernel = functools.partial(
        _dice_sums_kernel,
        num_classes=C, n_valid=N, tile_n=tile_n, needs_mask=needs_mask)

    part_shape = jax.ShapeDtypeStruct((num_partitions, B, 1, C), jnp.float32)

    inter_p, union_p = pl.pallas_call(
        kernel,
        out_shape=(part_shape, part_shape),
        grid_spec=pltpu.PrefetchScalarGridSpec(
            num_scalar_prefetch=0,
            grid=(B, num_partitions, tiles_per_part),
            in_specs=[
                pl.BlockSpec((1, C, tile_n),
                             lambda b, p, t, T=tiles_per_part: (b, 0, p * T + t)),
                pl.BlockSpec((1, 1, tile_n),
                             lambda b, p, t, T=tiles_per_part: (b, 0, p * T + t)),
            ],
            out_specs=[
                pl.BlockSpec((1, 1, 1, C), lambda b, p, t: (p, b, 0, 0)),
                pl.BlockSpec((1, 1, 1, C), lambda b, p, t: (p, b, 0, 0)),
            ],
            scratch_shapes=[
                pltpu.VMEM((C, tile_n), jnp.float32),
                pltpu.VMEM((C, tile_n), jnp.float32),
            ],
        ),
        compiler_params=pltpu.CompilerParams(
            dimension_semantics=("parallel", "parallel", "arbitrary"),
            vmem_limit_bytes=32 * 1024 * 1024,
        ),
    )(logits, tgt)

    # tiny [P, B, C] -> scalar finalization stays in plain JAX
    inter = jnp.sum(inter_p, axis=0).reshape(B, C)
    union = jnp.sum(union_p, axis=0).reshape(B, C)
    dice_score = (2.0 * inter + SMOOTH) / (union + SMOOTH)          # [B, C]
    weighted_dice = jnp.mean(class_weights[None, :] * (1.0 - dice_score))
    return weighted_dice


def _reference_loss(outputs, targets, class_weights):
    # pure-JAX reference mirroring the PyTorch forward
    B, C, H, W = outputs.shape
    probs = jax.nn.softmax(outputs, axis=1)
    valid = (targets != IGNORE_INDEX)
    probs = probs * valid[:, None, :, :].astype(probs.dtype)
    tgt = jnp.where(valid, targets, 0)
    probs = probs.reshape(B, C, -1)
    onehot = jax.nn.one_hot(tgt.reshape(B, -1), C, dtype=probs.dtype).transpose(0, 2, 1)
    inter = jnp.sum(probs * onehot, axis=2)
    union = jnp.sum(probs, axis=2) + jnp.sum(onehot, axis=2)
    dice = (2.0 * inter + SMOOTH) / (union + SMOOTH)
    return jnp.mean(class_weights[None, :] * (1.0 - dice))


if __name__ == "__main__":
    B, C, H, W = 2, 9, 16, 16   # num_classes must be >= 9 (indices 4, 8 are down-weighted)

    # deterministic parameter init (mirrors WeightedDiceLoss.__init__)
    class_weights = jnp.ones((C,), dtype=jnp.float32)
    class_weights = class_weights.at[4].multiply(0.2).at[8].multiply(0.2)

    key = jax.random.PRNGKey(0)
    k_logits, k_tgt, k_mask = jax.random.split(key, 3)
    outputs = jax.random.normal(k_logits, (B, C, H, W), dtype=jnp.float32)
    targets = jax.random.randint(k_tgt, (B, H, W), 0, C, dtype=jnp.int32)
    # sprinkle in some ignore_index pixels
    ignore = jax.random.bernoulli(k_mask, 0.1, (B, H, W))
    targets = jnp.where(ignore, IGNORE_INDEX, targets)

    loss = weighted_dice_loss(outputs, targets, class_weights)
    jax.block_until_ready(loss)

    ref = _reference_loss(outputs, targets, class_weights)
    assert jnp.allclose(loss, ref, atol=1e-5, rtol=1e-5), (loss, ref)

    # also exercise a padded / multi-tile / multi-partition configuration
    loss2 = weighted_dice_loss(outputs, targets, class_weights,
                               tile_n=128, num_partitions=2)
    jax.block_until_ready(loss2)
    assert jnp.allclose(loss2, ref, atol=1e-5, rtol=1e-5), (loss2, ref)

    print("KERNEL_OK")
</pallas_src>

<mosaic_0001>
module attributes {stable_mosaic.version = 11 : i64} {
  func.func @_dice_sums_kernel(%arg0: i32, %arg1: i32, %arg2: i32, %arg3: memref<1x9x256xf32, #tpu.memory_space<vmem>>, %arg4: memref<1x1x256xi32, #tpu.memory_space<vmem>>, %arg5: memref<1x1x1x9xf32, #tpu.memory_space<vmem>>, %arg6: memref<1x1x1x9xf32, #tpu.memory_space<vmem>>, %arg7: memref<9x256xf32, #tpu.memory_space<vmem>>, %arg8: memref<9x256xf32, #tpu.memory_space<vmem>>) attributes {dimension_semantics = [#tpu.dimension_semantics<parallel>, #tpu.dimension_semantics<parallel>, #tpu.dimension_semantics<arbitrary>], iteration_bounds = array<i64: 2, 1, 1>, scalar_prefetch = 0 : i64, scratch_operands = 2 : i64, tpu.core_type = #tpu.core_type<tc>, window_params = [{transform_indices = @transform_0, window_bounds = array<i64: 1, 9, 256>}, {transform_indices = @transform_1, window_bounds = array<i64: 1, 1, 256>}, {transform_indices = @transform_2, window_bounds = array<i64: 1, 1, 1, 9>}, {transform_indices = @transform_3, window_bounds = array<i64: 1, 1, 1, 9>}]} {
    %c0_i32 = arith.constant 0 : i32
    %0 = arith.cmpi eq, %arg2, %c0_i32 : i32
    %1 = arith.extui %0 : i1 to i32
    %c0_i32_0 = arith.constant 0 : i32
    %2 = arith.cmpi ne, %1, %c0_i32_0 : i32
    scf.if %2 {
      %cst_19 = arith.constant 0.000000e+00 : f32
      %42 = vector.broadcast %cst_19 : f32 to vector<9x256xf32>
      %c0_20 = arith.constant 0 : index
      %c0_21 = arith.constant 0 : index
      %43 = vector.load %arg7[%c0_20, %c0_21] : memref<9x256xf32, #tpu.memory_space<vmem>>, vector<9x256xf32>
      tpu.vector_store %arg7[%c0_20, %c0_21], %42 {strides = array<i32>} : memref<9x256xf32, #tpu.memory_space<vmem>>, vector<9x256xf32>,
      %cst_22 = arith.constant 0.000000e+00 : f32
      %44 = vector.broadcast %cst_22 : f32 to vector<9x256xf32>
      %c0_23 = arith.constant 0 : index
      %c0_24 = arith.constant 0 : index
      %45 = vector.load %arg8[%c0_23, %c0_24] : memref<9x256xf32, #tpu.memory_space<vmem>>, vector<9x256xf32>
      tpu.vector_store %arg8[%c0_23, %c0_24], %44 {strides = array<i32>} : memref<9x256xf32, #tpu.memory_space<vmem>>, vector<9x256xf32>,
    } else {
    }
    %c0 = arith.constant 0 : index
    %c0_1 = arith.constant 0 : index
    %c0_2 = arith.constant 0 : index
    %3 = vector.load %arg3[%c0, %c0_1, %c0_2] : memref<1x9x256xf32, #tpu.memory_space<vmem>>, vector<1x9x256xf32>
    %4 = vector.shape_cast %3 : vector<1x9x256xf32> to vector<9x256xf32>
    %c0_3 = arith.constant 0 : index
    %c0_4 = arith.constant 0 : index
    %c0_5 = arith.constant 0 : index
    %5 = vector.load %arg4[%c0_3, %c0_4, %c0_5] : memref<1x1x256xi32, #tpu.memory_space<vmem>>, vector<1x1x256xi32>
    %6 = vector.shape_cast %5 : vector<1x1x256xi32> to vector<1x256xi32>
    %cst = arith.constant dense<0xFF800000> : vector<256xf32>
    %7 = vector.multi_reduction <maximumf>, %4, %cst [0] : vector<9x256xf32> to vector<256xf32>
    %8 = vector.shape_cast %7 : vector<256xf32> to vector<1x256xf32>
    %9 = vector.broadcast %8 : vector<1x256xf32> to vector<9x256xf32>
    %10 = arith.subf %4, %9 : vector<9x256xf32>
    %11 = math.exp %10 : vector<9x256xf32>
    %cst_6 = arith.constant dense<0.000000e+00> : vector<256xf32>
    %12 = vector.multi_reduction <add>, %11, %cst_6 [0] : vector<9x256xf32> to vector<256xf32>
    %13 = vector.shape_cast %12 : vector<256xf32> to vector<1x256xf32>
    %14 = tpu.reciprocal %13 : vector<1x256xf32> -> vector<1x256xf32>
    %15 = vector.broadcast %14 : vector<1x256xf32> to vector<9x256xf32>
    %16 = arith.mulf %11, %15 : vector<9x256xf32>
    %c-1_i32 = arith.constant -1 : i32
    %17 = vector.broadcast %c-1_i32 : i32 to vector<1x256xi32>
    %18 = arith.cmpi ne, %6, %17 : vector<1x256xi32>
    %c0_i32_7 = arith.constant 0 : i32
    %19 = vector.broadcast %c0_i32_7 : i32 to vector<1x256xi32>
    %20 = arith.select %18, %6, %19 : vector<1x256xi1>, vector<1x256xi32>
    %21 = tpu.iota {dimensions = array<i32: 0>} : vector<9x256xi32>
    %22 = vector.broadcast %20 : vector<1x256xi32> to vector<9x256xi32>
    %23 = arith.cmpi eq, %21, %22 : vector<9x256xi32>
    %24 = arith.extui %18 : vector<1x256xi1> to vector<1x256xi32>
    %25 = arith.sitofp %24 : vector<1x256xi32> to vector<1x256xf32>
    %26 = vector.broadcast %25 : vector<1x256xf32> to vector<9x256xf32>
    %27 = arith.mulf %16, %26 : vector<9x256xf32>
    %c0_8 = arith.constant 0 : index
    %c0_9 = arith.constant 0 : index
    %28 = vector.load %arg7[%c0_8, %c0_9] : memref<9x256xf32, #tpu.memory_space<vmem>>, vector<9x256xf32>
    %cst_10 = arith.constant 0.000000e+00 : f32
    %29 = vector.broadcast %cst_10 : f32 to vector<9x256xf32>
    %30 = arith.select %23, %27, %29 : vector<9x256xi1>, vector<9x256xf32>
    %31 = arith.addf %28, %30 : vector<9x256xf32>
    %c0_11 = arith.constant 0 : index
    %c0_12 = arith.constant 0 : index
    %32 = vector.load %arg7[%c0_11, %c0_12] : memref<9x256xf32, #tpu.memory_space<vmem>>, vector<9x256xf32>
    tpu.vector_store %arg7[%c0_11, %c0_12], %31 {strides = array<i32>} : memref<9x256xf32, #tpu.memory_space<vmem>>, vector<9x256xf32>,
    %c0_13 = arith.constant 0 : index
    %c0_14 = arith.constant 0 : index
    %33 = vector.load %arg8[%c0_13, %c0_14] : memref<9x256xf32, #tpu.memory_space<vmem>>, vector<9x256xf32>
    %34 = arith.extui %23 : vector<9x256xi1> to vector<9x256xi32>
    %35 = arith.sitofp %34 : vector<9x256xi32> to vector<9x256xf32>
    %36 = arith.addf %27, %35 : vector<9x256xf32>
    %37 = arith.addf %33, %36 : vector<9x256xf32>
    %c0_15 = arith.constant 0 : index
    %c0_16 = arith.constant 0 : index
    %38 = vector.load %arg8[%c0_15, %c0_16] : memref<9x256xf32, #tpu.memory_space<vmem>>, vector<9x256xf32>
    tpu.vector_store %arg8[%c0_15, %c0_16], %37 {strides = array<i32>} : memref<9x256xf32, #tpu.memory_space<vmem>>, vector<9x256xf32>,
    %c0_i32_17 = arith.constant 0 : i32
    %39 = arith.cmpi eq, %arg2, %c0_i32_17 : i32
    %40 = arith.extui %39 : i1 to i32
    %c0_i32_18 = arith.constant 0 : i32
    %41 = arith.cmpi ne, %40, %c0_i32_18 : i32
    scf.if %41 {
      %c0_19 = arith.constant 0 : index
      %c0_20 = arith.constant 0 : index
      %42 = vector.load %arg7[%c0_19, %c0_20] : memref<9x256xf32, #tpu.memory_space<vmem>>, vector<9x256xf32>
      %cst_21 = arith.constant dense<0.000000e+00> : vector<9xf32>
      %43 = vector.multi_reduction <add>, %42, %cst_21 [1] : vector<9x256xf32> to vector<9xf32>
      %44 = vector.shape_cast %43 : vector<9xf32> to vector<1x1x1x9xf32>
      %c0_22 = arith.constant 0 : index
      %c0_23 = arith.constant 0 : index
      %c0_24 = arith.constant 0 : index
      %c0_25 = arith.constant 0 : index
      %45 = vector.load %arg5[%c0_22, %c0_23, %c0_24, %c0_25] : memref<1x1x1x9xf32, #tpu.memory_space<vmem>>, vector<1x1x1x9xf32>
      tpu.vector_store %arg5[%c0_22, %c0_23, %c0_24, %c0_25], %44 {strides = array<i32>} : memref<1x1x1x9xf32, #tpu.memory_space<vmem>>, vector<1x1x1x9xf32>,
      %c0_26 = arith.constant 0 : index
      %c0_27 = arith.constant 0 : index
      %46 = vector.load %arg8[%c0_26, %c0_27] : memref<9x256xf32, #tpu.memory_space<vmem>>, vector<9x256xf32>
      %cst_28 = arith.constant dense<0.000000e+00> : vector<9xf32>
      %47 = vector.multi_reduction <add>, %46, %cst_28 [1] : vector<9x256xf32> to vector<9xf32>
      %48 = vector.shape_cast %47 : vector<9xf32> to vector<1x1x1x9xf32>
      %c0_29 = arith.constant 0 : index
      %c0_30 = arith.constant 0 : index
      %c0_31 = arith.constant 0 : index
      %c0_32 = arith.constant 0 : index
      %49 = vector.load %arg6[%c0_29, %c0_30, %c0_31, %c0_32] : memref<1x1x1x9xf32, #tpu.memory_space<vmem>>, vector<1x1x1x9xf32>
      tpu.vector_store %arg6[%c0_29, %c0_30, %c0_31, %c0_32], %48 {strides = array<i32>} : memref<1x1x1x9xf32, #tpu.memory_space<vmem>>, vector<1x1x1x9xf32>,
    } else {
    }
    return
  }
  func.func @transform_0(%arg0: i32, %arg1: i32, %arg2: i32) -> (i32, i32, i32) {
    %c1_i32 = arith.constant 1 : i32
    %0 = arith.muli %arg1, %c1_i32 : i32
    %1 = arith.addi %0, %arg2 : i32
    %c0_i32 = arith.constant 0 : i32
    %c0_i32_0 = arith.constant 0 : i32
    return %arg0, %c0_i32, %1 : i32, i32, i32
  }
  func.func @transform_1(%arg0: i32, %arg1: i32, %arg2: i32) -> (i32, i32, i32) {
    %c1_i32 = arith.constant 1 : i32
    %0 = arith.muli %arg1, %c1_i32 : i32
    %1 = arith.addi %0, %arg2 : i32
    %c0_i32 = arith.constant 0 : i32
    %c0_i32_0 = arith.constant 0 : i32
    return %arg0, %c0_i32, %1 : i32, i32, i32
  }
  func.func @transform_2(%arg0: i32, %arg1: i32, %arg2: i32) -> (i32, i32, i32, i32) {
    %c0_i32 = arith.constant 0 : i32
    %c0_i32_0 = arith.constant 0 : i32
    %c0_i32_1 = arith.constant 0 : i32
    return %arg1, %arg0, %c0_i32, %c0_i32_0 : i32, i32, i32, i32
  }
  func.func @transform_3(%arg0: i32, %arg1: i32, %arg2: i32) -> (i32, i32, i32, i32) {
    %c0_i32 = arith.constant 0 : i32
    %c0_i32_0 = arith.constant 0 : i32
    %c0_i32_1 = arith.constant 0 : i32
    return %arg1, %arg0, %c0_i32, %c0_i32_0 : i32, i32, i32, i32
  }
}

</mosaic_0001>

<bundles_post_ra>
// kernel: weighted_dice_loss.1
= control target key start
LH: loop header
LB: loop body
LE: loop exit
PB: predicated region body
PF: predicated region fallthrough
CT: control target
= control target key end

     0   :  { %s712_s12 = smov 0   ;;  %s714_s13 = smov 0   ;;  %s797_s0 = inlined_call_operand.vmem [shape: f32[2,9,256], index: 0, kind: input, shape index: {}]   ;;  %s798_s1 = inlined_call_operand.vmem [shape: s32[2,1,256], index: 1, kind: input, shape index: {}]   ;;  %s799_s2 = inlined_call_operand.vmem [shape: f32[1,2,1,9], index: 2, kind: output, shape index: {0}]   ;;  %s800_s3 = inlined_call_operand.vmem [shape: f32[1,2,1,9], index: 3, kind: output, shape index: {1}]  }
   0x1   :  { %s716_s14 = smov 0  }
   0x2 LB: > { %s33_s15 = sadd.s32 1, %s685_s13  ;;  %p618_p0 = scmp.ge.s32.totalorder %s689_s14, 1  ;;  %s689_s14 = sphi %s716_s14, %s14_s14   ;;  %s685_s13 = sphi %s714_s13, %s802_s13   ;;  %s681_s12 = sphi %s712_s12, %s801_s12  }
   0x3   : > { %p35_p1 = scmp.ge.s32.totalorder %s33_s15, 2  ;;  %p194_p2 = scmp.lt.s32.totalorder %s689_s14, 3 }
   0x5   : > { %s804_s15 = smov (%p35_p1, %s33_s15), 0  ;;  %p195_p3 = pnand %p618_p0, %p194_p2 }
   0x6   : > { %p243_p4 = scmp.lt.s32.totalorder (!%p195_p3), %s681_s12, 1  ;;  %v691_v0 = vmov (!%p195_p3), 0.0   ;;  %vm295_vm0 = vcmask (!%p195_p3), 1040384   ;;  %v348_v43 = vlaneseq (!%p195_p3)  ;;  %vm448_vm6 = vcmask (!%p195_p3), 130112  }
   0x7   : > { %198 = sbr.rel (%p195_p3) target bundleno = 243 (0xf3), region = 28  ;;  %284 = vst [vmem:[#allocation2 + $0x10] sm:$0x1] (!%p195_p3), %v691_v0  ;;  %285 = vst [vmem:[#allocation2 + $0x18] sm:$0x1] (!%p195_p3), %v691_v0  ;;  %vm451_vm7 = vcmask (!%p195_p3), 65536  }
   0x8   : > { %288 = vst [vmem:[#allocation3 + $0x10] sm:$0x1] (!%p195_p3), %v691_v0  ;;  %289 = vst [vmem:[#allocation3 + $0x18] sm:$0x1] (!%p195_p3), %v691_v0  ;;  %v749_v49 = vshrl.u32 (!%p195_p3), %v348_v43, 7 }
   0xa   : > { %v353_v52 = vsub.s32 (!%p195_p3), 0, %v749_v49  ;;  %v357_v54 = vsub.s32 (!%p195_p3), 1, %v749_v49  ;;  %v350_v56 = vadd.s32 (!%p195_p3), 8, %v749_v49 }
   0xe   : > { %s806_s12 = smov (!%p243_p4, %s681_s12), 1 }
   0xf   : > { %s629_s16 = sshll.u32 %s806_s12, 5  ;;  %s621_s20 = sshll.u32 %s806_s12, 1 }
  0x10   : > { %s250_s19 = scalar_lea.vmem %s797_s0, %s629_s16  ;;  %s261_s23 = scalar_lea.vmem %s798_s1, %s621_s20 }
  0x11   : > { %v290_v1 = vld [vmem:[%s250_s19] sm:$0xff]  ;;  %v291_v2 = vld [vmem:[%s250_s19 + $0x8] sm:$0xff]  ;;  %v292_v3 = vld [vmem:[%s250_s19 + $0x10] sm:$0x1]  ;;  %s270_s26 = scalar_lea.vmem %s799_s2, %s806_s12  ;;  %s277_s29 = scalar_lea.vmem %s800_s3, %s806_s12 }
  0x12   : > { %v293_v4 = vld [vmem:[%s250_s19 + $0x18] sm:$0x1]  ;;  %v296_v5 = vsel %vm295_vm0, %v292_v3, -inf  ;;  %v294_v46 = vld [vmem:[%s261_s23] sm:$0x3] }
  0x13   : > { %v297_v6 = vmax.f32 %v290_v1, %v296_v5  ;;  %v304_v7 = vsel %vm295_vm0, %v293_v4, -inf  ;;  %vm346_vm1 = vcmp.ne.s32.totalorder %v294_v46, 4294967295 }
  0x14   : > { %v305_v8 = vmax.f32 %v291_v2, %v304_v7  ;;  %v347_v53 = vsel %vm346_vm1, %v294_v46, 0  ;;  %v622_v57 = vsel %vm346_vm1, 1.0, %v691_v0 }
  0x15   : > { %v298_v9 = vrot.slane %v297_v6, 4  ;;  %v354_v55 = vrot.slane %v347_v53, %v353_v52  ;;  %v358_v58 = vrot.slane %v347_v53, %v357_v54  ;;  %v369_v59 = vrot.slane %v622_v57, %v353_v52 }
  0x16   : > { %v306_v10 = vrot.slane %v305_v8, 4  ;;  %v373_v61 = vrot.slane %v622_v57, %v357_v54 }
  0x17   : > { %v299_v11 = vmax.f32 %v297_v6, %v298_v9  ;;  %vm359_vm2 = vcmp.eq.s32.totalorder %v749_v49, %v354_v55  ;;  %vm361_vm3 = vcmp.eq.s32.totalorder %v350_v56, %v354_v55  ;;  %vm360_vm4 = vcmp.eq.s32.totalorder %v749_v49, %v358_v58 }
  0x18   : > { %v307_v12 = vmax.f32 %v305_v8, %v306_v10  ;;  %vm362_vm5 = vcmp.eq.s32.totalorder %v350_v56, %v358_v58  ;;  %v625_v5 = vsel %vm361_vm3, 1.0, %v691_v0  ;;  %v624_v7 = vsel %vm360_vm4, 1.0, %v691_v0 }
  0x19   : > { %v300_v13 = vrot.slane %v299_v11, 2 }
  0x1a   : > { %v308_v14 = vrot.slane %v307_v12, 2 }
  0x1b   : > { %v301_v15 = vmax.f32 %v299_v11, %v300_v13  ;;  %v382_v11 = vld [vmem:[#allocation2 + $0x10] sm:$0x1]  ;;  %v626_v13 = vsel %vm362_vm5, 1.0, %v691_v0 }
  0x1c   : > { %v309_v16 = vmax.f32 %v307_v12, %v308_v14  ;;  %v383_v12 = vld [vmem:[#allocation2 + $0x18] sm:$0x1] }
  0x1d   : > { %v302_v17 = vrot.slane %v301_v15, 1 }
  0x1e   : > { %v310_v18 = vrot.slane %v309_v16, 1 }
  0x1f   : > { %v303_v19 = vmax.f32 %v301_v15, %v302_v17  ;;  %v398_v17 = vld [vmem:[#allocation3 + $0x10] sm:$0x1] }
  0x20   : > { %v311_v20 = vmax.f32 %v309_v16, %v310_v18 }
  0x21   : > { %v312_v21 = vsub.f32 %v290_v1, %v303_v19  ;;  %v314_v22 = vsub.f32 %v292_v3, %v303_v19  ;;  %v623_v3 = vsel %vm359_vm2, 1.0, %v691_v0 }
  0x22   : > { %v313_v23 = vsub.f32 %v291_v2, %v311_v20  ;;  %v315_v24 = vsub.f32 %v293_v4, %v311_v20 }
  0x23   : > { %v316_v25 = vmul.f32 1.442695, %v312_v21  ;;  %v320_v26 = vmul.f32 1.442695, %v314_v22 }
  0x24   : > { %v318_v27 = vmul.f32 1.442695, %v313_v23  ;;  %v322_v28 = vmul.f32 1.442695, %v315_v24  ;;  %v399_v24 = vld [vmem:[#allocation3 + $0x18] sm:$0x1] }
  0x25   : > { %655 = vpow2.f32 %v316_v25 }
  0x26   : > { %657 = vpow2.f32 %v318_v27 }
  0x27   : > { %659 = vpow2.f32 %v320_v26 }
  0x28   : > { %661 = vpow2.f32 %v322_v28 }
  0x2f   : > { %v656_v29 = vpop.eup %655 }
  0x30   : > { %v658_v30 = vpop.eup %657 }
  0x31   : > { %v660_v31 = vpop.eup %659 }
  0x32   : > { %v662_v32 = vpop.eup %661  ;;  %v324_v33 = vsel %vm295_vm0, %v660_v31, 0.0 }
  0x33   : > { %v325_v34 = vadd.f32 %v656_v29, %v324_v33  ;;  %v332_v35 = vsel %vm295_vm0, %v662_v32, 0.0 }
  0x34   : > { %v333_v36 = vadd.f32 %v658_v30, %v332_v35 }
  0x35   : > { %v326_v37 = vrot.slane %v325_v34, 4 }
  0x36   : > { %v334_v38 = vrot.slane %v333_v36, 4 }
  0x37   : > { %v327_v39 = vadd.f32 %v326_v37, %v325_v34 }
  0x38   : > { %v335_v40 = vadd.f32 %v334_v38, %v333_v36 }
  0x39   : > { %v328_v41 = vrot.slane %v327_v39, 2 }
  0x3a   : > { %v336_v42 = vrot.slane %v335_v40, 2 }
  0x3b   : > { %v329_v44 = vadd.f32 %v328_v41, %v327_v39  ;;  %v438_v39 = vand.u32 127, %v348_v43 }
  0x3c   : > { %v337_v45 = vadd.f32 %v336_v42, %v335_v40 }
  0x3d   : > { %v330_v47 = vrot.slane %v329_v44, 1  ;;  %v443_v40 = vadd.s32 4294967288, %v438_v39  ;;  %v441_v42 = vsub.s32 %v438_v39, %v749_v49 }
  0x3e   : > { %v338_v48 = vrot.slane %v337_v45, 1 }
  0x3f   : > { %v331_v50 = vadd.f32 %v330_v47, %v329_v44 }
  0x40   : > { %v339_v51 = vadd.f32 %v338_v48, %v337_v45  ;;  %v446_v45 = vsub.s32 %v443_v40, %v749_v49 }
  0x41   : > { %663 = vrcp.f32 %v331_v50 }
  0x42   : > { %665 = vrcp.f32 %v339_v51 }
  0x4b   : > { %v664_v60 = vpop.eup %663 }
  0x4c   : > { %v666_v62 = vpop.eup %665  ;;  %v342_v63 = vmul.f32 %v664_v60, %v656_v29  ;;  %v344_v1 = vmul.f32 %v664_v60, %v660_v31 }
  0x4d   : > { %v343_v2 = vmul.f32 %v666_v62, %v658_v30  ;;  %v345_v4 = vmul.f32 %v666_v62, %v662_v32 }
  0x4e   : > { %v376_v6 = vmul.f32 %v369_v59, %v342_v63  ;;  %v378_v8 = vmul.f32 %v369_v59, %v344_v1 }
  0x4f   : > { %v377_v9 = vmul.f32 %v373_v61, %v343_v2  ;;  %v379_v10 = vmul.f32 %v373_v61, %v345_v4 }
  0x50   : > { %v384_v14 = vsel %vm359_vm2, %v376_v6, 0.0  ;;  %v408_v15 = vadd.f32 %v623_v3, %v376_v6  ;;  %v386_v16 = vsel %vm361_vm3, %v378_v8, 0.0  ;;  %v410_v18 = vadd.f32 %v625_v5, %v378_v8 }
  0x51   : > { %v385_v19 = vsel %vm360_vm4, %v377_v9, 0.0  ;;  %v409_v20 = vadd.f32 %v624_v7, %v377_v9  ;;  %v387_v21 = vsel %vm362_vm5, %v379_v10, 0.0  ;;  %v390_v22 = vadd.f32 %v386_v16, %v382_v11 }
  0x52   : > { %v391_v23 = vadd.f32 %v387_v21, %v383_v12  ;;  %v411_v25 = vadd.f32 %v626_v13, %v379_v10  ;;  %v414_v26 = vadd.f32 %v410_v18, %v398_v17  ;;  %v427_v0 = vadd.f32 %v385_v19, %v384_v14 }
  0x53   : > { %394 = vst [vmem:[#allocation2 + $0x10] sm:$0x1] %v390_v22  ;;  %v457_v27 = vadd.f32 %v409_v20, %v408_v15 }
  0x54   : > { %395 = vst [vmem:[#allocation2 + $0x18] sm:$0x1] %v391_v23  ;;  %v415_v28 = vadd.f32 %v411_v25, %v399_v24  ;;  %418 = vst [vmem:[#allocation3 + $0x10] sm:$0x1] %v414_v26  ;;  %428 = vadd.xlane.f32.xlu0 %v427_v0 }
  0x55   : > { %458 = vadd.xlane.f32.xlu1 %v457_v27 }
  0x56   : > { %419 = vst [vmem:[#allocation3 + $0x18] sm:$0x1] %v415_v28 }
  0x5a   : > { %v425_v29 = vld [vmem:[#allocation2 + $0x10] sm:$0x1] }
  0x5b   : > { %v426_v30 = vld [vmem:[#allocation2 + $0x18] sm:$0x1]  ;;  %v430_v31 = vsel %vm295_vm0, %v425_v29, 0.0  ;;  %v455_v33 = vld [vmem:[#allocation3 + $0x10] sm:$0x1] }
  0x5c   : > { %v431_v32 = vsel %vm295_vm0, %v426_v30, 0.0  ;;  %v460_v35 = vsel %vm295_vm0, %v455_v33, 0.0 }
  0x5d   : > { %v432_v34 = vadd.f32 %v431_v32, %v430_v31  ;;  %v456_v36 = vld [vmem:[#allocation3 + $0x18] sm:$0x1] }
  0x5e   : > { %v461_v37 = vsel %vm295_vm0, %v456_v36, 0.0 }
  0x5f   : > { %433 = vadd.xlane.f32.xlu0 %v432_v34  ;;  %v462_v38 = vadd.f32 %v461_v37, %v460_v35 }
  0x61   : > { %463 = vadd.xlane.f32.xlu1 %v462_v38 }
  0xe1   : > { %v429_v41 = vpop.xlane.xlu0 %428 }
  0xe2   : > { %v459_v44 = vpop.xlane.xlu1 %458  ;;  %v442_v47 = vrot.slane %v429_v41, %v441_v42 }
  0xe3   : > { %v470_v43 = vrot.slane %v459_v44, %v441_v42 }
  0xec   : > { %v434_v46 = vpop.xlane.xlu0 %433 }
  0xed   : > { %v447_v48 = vrot.slane %v434_v46, %v446_v45 }
  0xee   : > { %v464_v51 = vpop.xlane.xlu1 %463 }
  0xef   : > { %v449_v50 = vsel %vm448_vm6, %v447_v48, %v442_v47  ;;  %v474_v52 = vrot.slane %v464_v51, %v446_v45 }
  0xf0   : > { %452 = vst.msk [vmem:[%s270_s26] sm:$0x1] %vm451_vm7, %v449_v50 }
  0xf1   : > { %v475_v53 = vsel %vm448_vm6, %v474_v52, %v470_v43 }
  0xf2   : > { %477 = vst.msk [vmem:[%s277_s29] sm:$0x1] %vm451_vm7, %v475_v53 }
  0xf3 PF: > { %s14_s14 = sadd.s32 1, %s689_s14   ;;  %s801_s12 = smov %s685_s13 }
  0xf4   : > { %p11_p5 = scmp.ge.s32.totalorder %s14_s14, 4   ;;  %s802_s13 = smov %s804_s15 }
  0xf6   :  { %13 = sbr.rel (!%p11_p5) target bundleno = 2 (0x2), region = 81 }

</bundles_post_ra>
